<compile_context>
chip_gen: v5e
topology: v5e:2x2
jax: 0.10.0
libtpu: 0.0.40
codegen_flags: <defaults>
</compile_context>

<pallas_src>
import jax
import jax.numpy as jnp
from jax import lax
from jax.experimental import pallas as pl
from jax.experimental.pallas import tpu as pltpu


def _round_up(x, m):
    return (x + m - 1) // m * m


# ----------------------------- Pass 1: normalize ------------------------------ #
def _normalize_kernel(f_ref, fn_ref):
    f = f_ref[...]                                            # (tile, Dp) f32
    sq = jnp.sum(f * f, axis=1, keepdims=True)                # (tile, 1)
    # rsqrt(max(||x||^2, 1e-24)) == 1 / max(||x||, 1e-12): matches F.normalize eps.
    inv = lax.rsqrt(jnp.maximum(sq, 1e-24))
    fn_ref[...] = (f * inv).astype(fn_ref.dtype)


# --------------------- Pass 2: symmetric tiled Gram + partial sums ------------- #
def _fold_sublanes(x):
    """(tm, tn) -> (8, tn) by summing 8-row (sublane-tile) groups: pure vreg adds."""
    tm = x.shape[0]
    acc = x[0:8, :]
    for r in range(1, tm // 8):
        acc = acc + x[r * 8:(r + 1) * 8, :]
    return acc


def _gram_reduce_kernel(ii_ref, jj_ref, fn_i_ref, fn_j_ref, lab_i_ref, lab_j_ref, out_ref):
    t = pl.program_id(0)
    i = ii_ref[t]
    j = jj_ref[t]
    is_diag = i == j

    # Row-major upper-triangular enumeration: the first pair of each row-tile run is the
    # diagonal tile (i, i) -> initialize the resident output block there.
    @pl.when(is_diag)
    def _init():
        out_ref[...] = jnp.zeros_like(out_ref)

    # (tm, Dp) x (tn, Dp), contracted over D on the MXU with f32 accumulation (no transpose).
    dot = lax.dot_general(fn_i_ref[...], fn_j_ref[...],
                          dimension_numbers=(((1,), (1,)), ((), ())),
                          preferred_element_type=jnp.float32)          # (tm, tn) f32

    # Label-equality mask.  Padded rows have exactly-zero features, so their dot entries are
    # exactly 0 and cannot contaminate either sum regardless of their (sentinel) label.
    eq = lab_i_ref[...] == lab_j_ref[...]                              # (tm, tn) bool
    mdot = jnp.where(eq, dot, 0.0)

    # Pure-VALU fold to (8, tn) lane partials; cross-lane reduction is deferred to the wrapper.
    pd = _fold_sublanes(dot)
    pm = _fold_sublanes(mdot)

    # Off-diagonal tile pairs are visited once but stand for both (i, j) and (j, i).
    w = jnp.where(is_diag, jnp.float32(1.0), jnp.float32(2.0))
    out_ref[0] += pd * w                                               # sum(dot) partials
    out_ref[1] += pm * w                                               # sum(mask*dot) partials


# ----------------------------------- wrapper ----------------------------------- #
def supcon_loss(features, labels, *, tile=256, gram_dtype=jnp.bfloat16):
    """features: (N, D) float, labels: (N,) int  ->  scalar float32 SupCon loss."""
    n, d = features.shape
    dp = _round_up(d, 128)                    # lane-dense feature dim (zero cols are harmless)

    n8 = _round_up(n, 8)
    if n8 <= tile:                            # single tile: full-dim blocks everywhere
        tile_n = n8
    else:                                     # multi-tile: keep lane-facing blocks 128-aligned
        tile_n = _round_up(tile, 128)
    np_ = _round_up(n, tile_n)
    nr = np_ // tile_n

    f = jnp.zeros((np_, dp), jnp.float32).at[:n, :d].set(features.astype(jnp.float32))
    # Sentinel label for padded rows (defensive only: padded features are exactly zero,
    # so padded pairs contribute 0 to every dot-product sum no matter what label they carry).
    lab_col = jnp.full((np_, 1), -1, jnp.int32).at[:n, 0].set(labels.astype(jnp.int32))
    lab_row = lab_col.reshape(1, np_)

    # ---- Pass 1: row-wise L2 normalization (rsqrt on EUP), emit Gram operand dtype ----
    fn = pl.pallas_call(
        _normalize_kernel,
        out_shape=jax.ShapeDtypeStruct((np_, dp), gram_dtype),
        grid=(nr,),
        in_specs=[pl.BlockSpec((tile_n, dp), lambda i: (i, 0))],
        out_specs=pl.BlockSpec((tile_n, dp), lambda i: (i, 0)),
        compiler_params=pltpu.CompilerParams(dimension_semantics=("parallel",)),
    )(f)

    # ---- Pass 2: upper-triangular tile pairs only, scalar-prefetched (i, j) indices ----
    pairs = [(i, j) for i in range(nr) for j in range(i, nr)]   # row-major: output-block
    ii = jnp.array([p[0] for p in pairs], jnp.int32)            # revisits are consecutive
    jj = jnp.array([p[1] for p in pairs], jnp.int32)

    partials = pl.pallas_call(
        _gram_reduce_kernel,
        out_shape=jax.ShapeDtypeStruct((2, nr * 8, tile_n), jnp.float32),
        grid_spec=pltpu.PrefetchScalarGridSpec(
            num_scalar_prefetch=2,
            grid=(len(pairs),),
            in_specs=[
                pl.BlockSpec((tile_n, dp), lambda t, ii, jj: (ii[t], 0)),   # fn row tile
                pl.BlockSpec((tile_n, dp), lambda t, ii, jj: (jj[t], 0)),   # fn col tile
                pl.BlockSpec((tile_n, 1), lambda t, ii, jj: (ii[t], 0)),    # labels (col view)
                pl.BlockSpec((1, tile_n), lambda t, ii, jj: (0, jj[t])),    # labels (row view)
            ],
            out_specs=pl.BlockSpec((2, 8, tile_n), lambda t, ii, jj: (0, ii[t], 0)),
        ),
        compiler_params=pltpu.CompilerParams(dimension_semantics=("arbitrary",)),
    )(ii, jj, fn, fn, lab_col, lab_row)

    s_dot = jnp.sum(partials[0])              # sum_{a,b} fn_a . fn_b
    s_mdot = jnp.sum(partials[1])             # sum_{a,b} [lab_a == lab_b] fn_a . fn_b

    # sum(mask) = sum_c n_c^2 -- computed once from the raw labels, outside the Gram kernel.
    # TODO(synk): replace with an O(N) bincount when the label range is bounded.
    lab = labels.astype(jnp.int32)
    s_mask = jnp.sum((lab[:, None] == lab[None, :]).astype(jnp.float32))
    # trace(fn fn^T); only feeds the 0-weighted positive branch of the reference formula.
    s_tr = jnp.sum(jnp.square(fn.astype(jnp.float32)))

    nf = jnp.float32(n)
    # mask_pos = mask with the diagonal zeroed; mask_neg = logical complement of mask
    # (the module's `(~mask)` is the complement of the label-equality mask).
    pos_pairs_mean = (s_mdot - s_tr) / ((s_mask - nf) + 1e-6)
    neg_pairs_mean = (s_dot - s_mdot) / ((nf * nf - s_mask) + 1e-6)
    return 0.0 * (1.0 - pos_pairs_mean) + (1.0 + neg_pairs_mean)


# ---------------------------------- reference ---------------------------------- #
def _reference(features, labels):
    f = features.astype(jnp.float32)
    norm = jnp.sqrt(jnp.sum(f * f, axis=1, keepdims=True))
    fn = f / jnp.maximum(norm, 1e-12)
    mask = (labels[:, None] == labels[None, :]).astype(jnp.float32)
    eye = jnp.eye(labels.shape[0], dtype=jnp.float32)
    mask_pos = mask * (1.0 - eye)
    mask_neg = 1.0 - mask
    # exact f32 elementwise Gram (avoids MXU precision ambiguity in the reference)
    dot = jnp.sum(fn[:, None, :] * fn[None, :, :], axis=-1)
    pos = jnp.sum(mask_pos * dot) / (jnp.sum(mask_pos) + 1e-6)
    neg = jnp.sum(mask_neg * dot) / (jnp.sum(mask_neg) + 1e-6)
    return 0.0 * (1.0 - pos) + (1.0 + neg)


if __name__ == "__main__":
    key = jax.random.PRNGKey(0)
    k_feat, k_lab, k_feat2, k_lab2 = jax.random.split(key, 4)

    # Small case (single tile, shrunk to 8 rows): both Gram dtypes.
    N, D = 8, 32
    features = jax.random.normal(k_feat, (N, D), dtype=jnp.float32)
    labels = jax.random.randint(k_lab, (N,), 0, 3, dtype=jnp.int32)
    ref = _reference(features, labels)

    loss_f32 = supcon_loss(features, labels, gram_dtype=jnp.float32)
    jax.block_until_ready(loss_f32)
    assert jnp.allclose(loss_f32, ref, atol=1e-2), (loss_f32, ref)

    loss_bf16 = supcon_loss(features, labels)
    jax.block_until_ready(loss_bf16)
    assert jnp.allclose(loss_bf16, ref, atol=2e-2), (loss_bf16, ref)

    # Multi-tile case (nr=2, 3 upper-triangular tile pairs, row padding 200 -> 256):
    # exercises the symmetric enumeration, off-diagonal doubling and output revisiting.
    N2, D2 = 200, 32
    features2 = jax.random.normal(k_feat2, (N2, D2), dtype=jnp.float32)
    labels2 = jax.random.randint(k_lab2, (N2,), 0, 5, dtype=jnp.int32)
    ref2 = _reference(features2, labels2)

    loss2 = supcon_loss(features2, labels2, tile=128, gram_dtype=jnp.float32)
    jax.block_until_ready(loss2)
    assert jnp.allclose(loss2, ref2, atol=1e-2), (loss2, ref2)

    print("KERNEL_OK")
</pallas_src>

<mosaic_0001>
module attributes {stable_mosaic.version = 11 : i64} {
  func.func @_normalize_kernel(%arg0: i32, %arg1: memref<8x128xf32, #tpu.memory_space<vmem>>, %arg2: memref<8x128xf32, #tpu.memory_space<vmem>>) attributes {dimension_semantics = [#tpu.dimension_semantics<parallel>], iteration_bounds = array<i64: 1>, scalar_prefetch = 0 : i64, scratch_operands = 0 : i64, tpu.core_type = #tpu.core_type<tc>, window_params = [{transform_indices = @transform_0, window_bounds = array<i64: 8, 128>}, {transform_indices = @transform_1, window_bounds = array<i64: 8, 128>}]} {
    %c0 = arith.constant 0 : index
    %c0_0 = arith.constant 0 : index
    %0 = vector.load %arg1[%c0, %c0_0] : memref<8x128xf32, #tpu.memory_space<vmem>>, vector<8x128xf32>
    %1 = arith.mulf %0, %0 : vector<8x128xf32>
    %cst = arith.constant dense<0.000000e+00> : vector<8xf32>
    %2 = vector.multi_reduction <add>, %1, %cst [1] : vector<8x128xf32> to vector<8xf32>
    %3 = vector.shape_cast %2 : vector<8xf32> to vector<8x1xf32>
    %cst_1 = arith.constant 1.000000e-24 : f32
    %4 = vector.broadcast %cst_1 : f32 to vector<8x1xf32>
    %5 = arith.maximumf %3, %4 : vector<8x1xf32>
    %6 = math.rsqrt %5 : vector<8x1xf32>
    %7 = vector.broadcast %6 : vector<8x1xf32> to vector<8x128xf32>
    %8 = arith.mulf %0, %7 : vector<8x128xf32>
    %c0_2 = arith.constant 0 : index
    %c0_3 = arith.constant 0 : index
    %9 = vector.load %arg2[%c0_2, %c0_3] : memref<8x128xf32, #tpu.memory_space<vmem>>, vector<8x128xf32>
    tpu.vector_store %arg2[%c0_2, %c0_3], %8 {strides = array<i32>} : memref<8x128xf32, #tpu.memory_space<vmem>>, vector<8x128xf32>,
    return
  }
  func.func @transform_0(%arg0: i32) -> (i32, i32) {
    %c0_i32 = arith.constant 0 : i32
    %c0_i32_0 = arith.constant 0 : i32
    return %arg0, %c0_i32 : i32, i32
  }
  func.func @transform_1(%arg0: i32) -> (i32, i32) {
    %c0_i32 = arith.constant 0 : i32
    %c0_i32_0 = arith.constant 0 : i32
    return %arg0, %c0_i32 : i32, i32
  }
}

</mosaic_0001>

<bundles_post_ra>
// kernel: tpu_custom_call.1
= control target key start
LH: loop header
LB: loop body
LE: loop exit
PB: predicated region body
PF: predicated region fallthrough
CT: control target
= control target key end

     0   :  { %6 = vsyncpa [#allocation3], 0  ;;  %s131_s0 = inlined_call_operand.hbm [shape: f32[8,128], index: 0, kind: input, shape index: {}]   ;;  %s132_s1 = inlined_call_operand.hbm [shape: f32[8,128], index: 1, kind: output, shape index: {}]  }
   0x1   :  { %7 = vsyncpa [#allocation4], 0  ;;  %s13_s8 = sshll.u32 %s131_s0, 4  ;;  %s113_s9 = smov [#allocation2]   ;;  %s14_s8 = int_to_ptr.hbm [resolvable:$true] %s13_s8 }
   0x2   :  { %s15_s10 = sshll.u32 %s113_s9, 4  ;;  %s16_s10 = int_to_ptr.vmem [resolvable:$true] %s15_s10 }
   0x3   :  { %18 = dma.hbm_to_vmem [thread:$0]  %s14_s8, 128, %s16_s10, [#allocation3]  }
   0x4   :  { %109 = dma.done.wait [#allocation3], 128  }
   0x5   :  { %110 = vsyncadd [#allocation3], 4294967168  ;;  %v23_v0 = vld [vmem:[#allocation2] sm:$0xff]  ;;  %s114_s0 = smov [#allocation5]   ;;  %s47_s14 = sshll.u32 %s132_s1, 4  ;;  %s48_s14 = int_to_ptr.hbm [resolvable:$true] %s47_s14 }
   0x6   :  { %v24_v1 = vmul.f32 %v23_v0, %v23_v0  ;;  %s45_s11 = sshll.u32 %s114_s0, 4  ;;  %s46_s11 = int_to_ptr.vmem [resolvable:$true] %s45_s11 }
   0x8   :  { %25 = vadd.xlane.f32.xlu0 %v24_v1 }
  0x7b   :  { %v26_v2 = vpop.xlane.xlu0 %25 }
  0x7c   :  { %v27_v3 = vmax.f32 %v26_v2, 1e-24 }
  0x7e   :  { %59 = vrsqrt.f32 %v27_v3  ;;  %vm34_vm1 = vweird.f32 %v27_v3 }
  0x84   :  { %v60_v4 = vpop.eup %59 }
  0x85   :  { %v29_v5 = vmul.f32 %v60_v4, %v27_v3  ;;  %vm35_vm0 = vweird.f32 %v60_v4 }
  0x86   :  { %vm36_vm2 = vmor %vm34_vm1, %vm35_vm0 }
  0x87   :  { %v30_v6 = vmul.f32 %v60_v4, %v29_v5 }
  0x89   :  { %v31_v7 = vmul.f32 0.5, %v30_v6 }
  0x8b   :  { %v32_v8 = vsub.f32 1.5, %v31_v7 }
  0x8d   :  { %v33_v9 = vmul.f32 %v60_v4, %v32_v8 }
  0x8f   :  { %v37_v10 = vsel %vm36_vm2, %v60_v4, %v33_v9 }
  0x90   :  { %v38_v11 = vmul.f32 %v37_v10, %v23_v0 }
  0x92   :  { %39 = vst [vmem:[#allocation5] sm:$0xff] %v38_v11 }
  0x93   :  { %50 = dma.vmem_to_hbm [thread:$0]  %s46_s11, 128, %s48_s14, [#allocation4]  }
  0x94   :  { %111 = dma.done.wait [#allocation4], 128  }
  0x95   :  { %112 = vsyncadd [#allocation4], 4294967168 }
  0x96   :  { %55 = vsyncpa [#allocation3], 1 }
  0x97   :  { %56 = vsyncpa [#allocation4], 1 }

</bundles_post_ra>
